<compile_context>
chip_gen: v5e
topology: v5e:2x2
jax: 0.10.0
libtpu: 0.0.40
codegen_flags: <defaults>
</compile_context>

<pallas_src>
import math
import functools

import jax
import jax.numpy as jnp
from jax.experimental import pallas as pl
from jax.experimental.pallas import tpu as pltpu


def _make_dense_kernel(use_bias: bool, activation: bool,
                       add_x_residual: bool, use_res_mat: bool):
    """Builds the fused Dense kernel; flags are static / compiled in."""

    def _compute(x_ref, w_ref, b_ref, r_ref, o_ref):
        x = x_ref[...]                                          # (TN, C*IN)
        out = jnp.dot(x, w_ref[...], preferred_element_type=jnp.float32)
        if use_bias:
            out = out + b_ref[...]                              # (1, C*OUT) broadcast
        if activation:
            out = jnp.tanh(out)
        if add_x_residual:                                      # residual, OUT == IN
            out = out + x
        if use_res_mat:                                         # residual, OUT == 2*IN, w/ tanh
            out = out + jnp.dot(x, r_ref[...], preferred_element_type=jnp.float32)
        o_ref[...] = out.astype(o_ref.dtype)

    if use_bias and use_res_mat:
        def kernel(x_ref, w_ref, b_ref, r_ref, o_ref):
            _compute(x_ref, w_ref, b_ref, r_ref, o_ref)
    elif use_bias:
        def kernel(x_ref, w_ref, b_ref, o_ref):
            _compute(x_ref, w_ref, b_ref, None, o_ref)
    elif use_res_mat:
        def kernel(x_ref, w_ref, r_ref, o_ref):
            _compute(x_ref, w_ref, None, r_ref, o_ref)
    else:
        def kernel(x_ref, w_ref, o_ref):
            _compute(x_ref, w_ref, None, None, o_ref)
    return kernel


def _row_tile(n_rows: int, cin: int, cout: int) -> int:
    """Largest row tile (<=512, multiple of 8 or == n_rows) whose double-buffered
    x + out blocks stay well within the smallest (v7x) scoped-VMEM budget."""
    tn = min(n_rows, 512)
    while tn > 8 and 2 * 4 * tn * (cin + cout) > 24 * 1024 * 1024:
        tn //= 2
    return tn


@functools.partial(jax.jit, static_argnames=("activation", "residual"))
def dense_forward(x, channels, weight, bias, *, activation: bool, residual: bool):
    """Pallas equivalent of Dense.forward((x, channels)) -> (out, channels)."""
    N, C, IN = x.shape
    num_channels, OUT, IN_w = weight.shape
    assert IN == IN_w
    use_bias = bias is not None

    if residual and OUT not in (IN, 2 * IN):
        raise NotImplementedError("Not implemented")

    fold_residual = residual and not activation
    add_x_residual = residual and activation and OUT == IN
    use_res_mat = residual and activation and OUT == 2 * IN

    channels = channels.astype(jnp.int32)
    dtype = x.dtype
    CIN, COUT = C * IN, C * OUT

    # --- pre-gather + fuse parameters (tiny; done once in the wrapper) -------
    w_g = jnp.transpose(weight[channels], (0, 2, 1)).astype(dtype)   # (C, IN, OUT)
    if fold_residual:
        eye = jnp.eye(IN, dtype=dtype)
        res_blk = eye if OUT == IN else jnp.concatenate([eye, eye], axis=1)
        w_g = w_g + res_blk[None]                                    # fold residual
    # block-diagonal fused weight: W[c*IN+i, c*OUT+o] = w_g[c, i, o]
    w_bd = jnp.einsum("cd,cio->cido", jnp.eye(C, dtype=dtype), w_g)
    w_bd = w_bd.reshape(CIN, COUT)

    x_flat = x.reshape(N, CIN)             # free reshape, no transpose kernels

    tn = _row_tile(N, CIN, COUT)

    in_specs = [
        pl.BlockSpec((tn, CIN), lambda i: (i, 0)),       # row tile of x
        pl.BlockSpec((CIN, COUT), lambda i: (0, 0)),     # fused weight (resident)
    ]
    operands = [x_flat, w_bd]

    if use_bias:
        b_flat = bias[channels].astype(dtype).reshape(1, COUT)
        in_specs.append(pl.BlockSpec((1, COUT), lambda i: (0, 0)))
        operands.append(b_flat)

    if use_res_mat:
        eye = jnp.eye(IN, dtype=dtype)
        r_bd = jnp.kron(jnp.eye(C, dtype=dtype),
                        jnp.concatenate([eye, eye], axis=1))         # (CIN, COUT)
        in_specs.append(pl.BlockSpec((CIN, COUT), lambda i: (0, 0)))
        operands.append(r_bd)

    kernel = _make_dense_kernel(use_bias, activation, add_x_residual, use_res_mat)

    # VMEM budget: double-buffered x/out row blocks + resident weight/bias (+dup).
    vmem_bytes = 8 * (tn * (CIN + COUT) + CIN * COUT + COUT)
    if use_res_mat:
        vmem_bytes += 8 * CIN * COUT
    vmem_limit = int(min(max(vmem_bytes + (2 << 20), 32 * 1024 * 1024),
                         64 * 1024 * 1024))

    out_flat = pl.pallas_call(
        kernel,
        out_shape=jax.ShapeDtypeStruct((N, COUT), dtype),
        grid=(pl.cdiv(N, tn),),
        in_specs=in_specs,
        out_specs=pl.BlockSpec((tn, COUT), lambda i: (i, 0)),
        compiler_params=pltpu.CompilerParams(
            dimension_semantics=("parallel",),
            vmem_limit_bytes=vmem_limit,
        ),
    )(*operands)

    return out_flat.reshape(N, C, OUT), channels


def init_dense_params(key, num_channels, in_features, out_features, use_bias=True):
    """Deterministic init mimicking Dense.reset_parameters():
    kaiming_uniform_(a=sqrt(5)) and bias ~ U(-1/sqrt(fan_in), 1/sqrt(fan_in))."""
    kw, kb = jax.random.split(key)
    bound = 1.0 / math.sqrt(in_features)
    weight = jax.random.uniform(
        kw, (num_channels, out_features, in_features),
        minval=-bound, maxval=bound, dtype=jnp.float32)
    bias = None
    if use_bias:
        bias = jax.random.uniform(
            kb, (num_channels, out_features),
            minval=-bound, maxval=bound, dtype=jnp.float32)
    return weight, bias


def dense_reference(x, channels, weight, bias, *, activation, residual):
    """Pure-JAX reference matching the PyTorch forward exactly."""
    w = weight[channels]                                   # (C, OUT, IN)
    out = jnp.einsum("nci,coi->nco", x, w)                 # bmm + transposes
    if bias is not None:
        out = out + bias[channels]
    if activation:
        out = jnp.tanh(out)
    if residual:
        if out.shape[2] == x.shape[2]:
            out = out + x
        elif out.shape[2] == 2 * x.shape[2]:
            out = out + jnp.concatenate([x, x], axis=2)
        else:
            raise NotImplementedError("Not implemented")
    return out, channels


if __name__ == "__main__":
    key = jax.random.PRNGKey(0)
    k_x, k_p1, k_p2, k_p3, k_p4 = jax.random.split(key, 5)

    # Small DeepPot-SE-like shapes: N=128 rows, C=8 selected channels,
    # num_channels=12 element types, embedding width IN=16 (C*IN = 128 lanes).
    N, C, num_channels, IN = 128, 8, 12, 16
    x = jax.random.normal(k_x, (N, C, IN), dtype=jnp.float32)
    channels = jnp.array([3, 0, 5, 2, 7, 11, 1, 9], dtype=jnp.int32)

    # Case 1: tanh activation + residual (OUT == IN), with bias.
    w1, b1 = init_dense_params(k_p1, num_channels, IN, IN, use_bias=True)
    out1, _ = dense_forward(x, channels, w1, b1, activation=True, residual=True)
    ref1, _ = dense_reference(x, channels, w1, b1, activation=True, residual=True)

    # Case 2: plain linear + bias, OUT = 2*IN, residual folded into the weight.
    w2, b2 = init_dense_params(k_p2, num_channels, IN, 2 * IN, use_bias=True)
    out2, _ = dense_forward(x, channels, w2, b2, activation=False, residual=True)
    ref2, _ = dense_reference(x, channels, w2, b2, activation=False, residual=True)

    # Case 3: tanh, no bias, no residual (covers the bias-free kernel path).
    w3, _ = init_dense_params(k_p3, num_channels, IN, 2 * IN, use_bias=False)
    out3, _ = dense_forward(x, channels, w3, None, activation=True, residual=False)
    ref3, _ = dense_reference(x, channels, w3, None, activation=True, residual=False)

    # Case 4: tanh + residual with OUT = 2*IN (in-kernel duplication matrix).
    w4, b4 = init_dense_params(k_p4, num_channels, IN, 2 * IN, use_bias=True)
    out4, _ = dense_forward(x, channels, w4, b4, activation=True, residual=True)
    ref4, _ = dense_reference(x, channels, w4, b4, activation=True, residual=True)

    jax.block_until_ready((out1, out2, out3, out4))

    assert out1.shape == (N, C, IN)
    assert out2.shape == (N, C, 2 * IN)
    for got, ref in ((out1, ref1), (out2, ref2), (out3, ref3), (out4, ref4)):
        err = float(jnp.max(jnp.abs(got - ref)))
        assert jnp.allclose(got, ref, atol=5e-5, rtol=5e-5), err

    print("KERNEL_OK")
</pallas_src>

<mosaic_0001>
module attributes {stable_mosaic.version = 11 : i64} {
  func.func @kernel(%arg0: i32, %arg1: memref<128x128xf32, #tpu.memory_space<vmem>>, %arg2: memref<128x128xf32, #tpu.memory_space<vmem>>, %arg3: memref<1x128xf32, #tpu.memory_space<vmem>>, %arg4: memref<128x128xf32, #tpu.memory_space<vmem>>) attributes {dimension_semantics = [#tpu.dimension_semantics<parallel>], iteration_bounds = array<i64: 1>, scalar_prefetch = 0 : i64, scratch_operands = 0 : i64, tpu.core_type = #tpu.core_type<tc>, window_params = [{transform_indices = @transform_0, window_bounds = array<i64: 128, 128>}, {pipeline_mode = #tpu.pipeline_mode<synchronous>, transform_indices = @transform_1, window_bounds = array<i64: 128, 128>}, {pipeline_mode = #tpu.pipeline_mode<synchronous>, transform_indices = @transform_2, window_bounds = array<i64: 1, 128>}, {transform_indices = @transform_3, window_bounds = array<i64: 128, 128>}]} {
    %c0 = arith.constant 0 : index
    %c0_0 = arith.constant 0 : index
    %0 = vector.load %arg1[%c0, %c0_0] : memref<128x128xf32, #tpu.memory_space<vmem>>, vector<128x128xf32>
    %c0_1 = arith.constant 0 : index
    %c0_2 = arith.constant 0 : index
    %1 = vector.load %arg2[%c0_1, %c0_2] : memref<128x128xf32, #tpu.memory_space<vmem>>, vector<128x128xf32>
    %cst = arith.constant dense<0.000000e+00> : vector<128x128xf32>
    %2 = tpu.matmul %0, %1, %cst {dimension_numbers = #tpu.dot_dimension_numbers<[1], [0], [0], [1], [0, 0, 1, 1], [], []>} : vector<128x128xf32>, vector<128x128xf32>, vector<128x128xf32> -> vector<128x128xf32>
    %c0_3 = arith.constant 0 : index
    %c0_4 = arith.constant 0 : index
    %3 = vector.load %arg3[%c0_3, %c0_4] : memref<1x128xf32, #tpu.memory_space<vmem>>, vector<1x128xf32>
    %4 = vector.broadcast %3 : vector<1x128xf32> to vector<128x128xf32>
    %5 = arith.addf %2, %4 : vector<128x128xf32>
    %6 = math.tanh %5 : vector<128x128xf32>
    %7 = arith.addf %6, %0 : vector<128x128xf32>
    %c0_5 = arith.constant 0 : index
    %c0_6 = arith.constant 0 : index
    %8 = vector.load %arg4[%c0_5, %c0_6] : memref<128x128xf32, #tpu.memory_space<vmem>>, vector<128x128xf32>
    tpu.vector_store %arg4[%c0_5, %c0_6], %7 {strides = array<i32>} : memref<128x128xf32, #tpu.memory_space<vmem>>, vector<128x128xf32>,
    return
  }
  func.func @transform_0(%arg0: i32) -> (i32, i32) {
    %c0_i32 = arith.constant 0 : i32
    %c0_i32_0 = arith.constant 0 : i32
    return %arg0, %c0_i32 : i32, i32
  }
  func.func @transform_1(%arg0: i32) -> (i32, i32) {
    %c0_i32 = arith.constant 0 : i32
    %c0_i32_0 = arith.constant 0 : i32
    %c0_i32_1 = arith.constant 0 : i32
    return %c0_i32, %c0_i32_0 : i32, i32
  }
  func.func @transform_2(%arg0: i32) -> (i32, i32) {
    %c0_i32 = arith.constant 0 : i32
    %c0_i32_0 = arith.constant 0 : i32
    %c0_i32_1 = arith.constant 0 : i32
    return %c0_i32, %c0_i32_0 : i32, i32
  }
  func.func @transform_3(%arg0: i32) -> (i32, i32) {
    %c0_i32 = arith.constant 0 : i32
    %c0_i32_0 = arith.constant 0 : i32
    return %arg0, %c0_i32 : i32, i32
  }
}

</mosaic_0001>

<bundles_post_ra>
// kernel: dense_forward.1
= control target key start
LH: loop header
LB: loop body
LE: loop exit
PB: predicated region body
PF: predicated region fallthrough
CT: control target
= control target key end

     0   :  { %s489_s1 = inlined_call_operand.vmem [shape: f32[128,128], index: 1, kind: input, shape index: {}]   ;;  %s490_s2 = inlined_call_operand.vmem [shape: f32[1,128], index: 2, kind: input, shape index: {}]   ;;  %s491_s0 = inlined_call_operand.vmem [shape: f32[128,128], index: 0, kind: input, shape index: {}]   ;;  %s492_s3 = inlined_call_operand.vmem [shape: f32[128,128], index: 3, kind: output, shape index: {}]  }
   0x1   :  { %v45_v0 = vld [vmem:[%s489_s1 + $0x78] sm:$0xff]  ;;  %v44_v1 = vld [vmem:[%s489_s1 + $0x70] sm:$0xff]  ;;  %v43_v2 = vld [vmem:[%s489_s1 + $0x68] sm:$0xff] }
   0x2   :  { %168 = vmatpush.msra.mxu2 %v45_v0  ;;  %169 = vmatpush.msra.mxu3 %v45_v0  ;;  %v42_v3 = vld [vmem:[%s489_s1 + $0x60] sm:$0xff]  ;;  %v41_v4 = vld [vmem:[%s489_s1 + $0x58] sm:$0xff]  ;;  %v40_v5 = vld [vmem:[%s489_s1 + $0x50] sm:$0xff] }
   0x3   :  { %50 = vmatpush.msra.mxu0 %v45_v0  ;;  %167 = vmatpush.msra.mxu1 %v45_v0  ;;  %v39_v6 = vld [vmem:[%s489_s1 + $0x48] sm:$0xff]  ;;  %v38_v7 = vld [vmem:[%s489_s1 + $0x40] sm:$0xff]  ;;  %v37_v8 = vld [vmem:[%s489_s1 + $0x38] sm:$0xff] }
   0x4   :  { %171 = vmatpush.msra.mxu2 %v44_v1  ;;  %172 = vmatpush.msra.mxu3 %v44_v1  ;;  %v36_v9 = vld [vmem:[%s489_s1 + $0x30] sm:$0xff]  ;;  %v35_v10 = vld [vmem:[%s489_s1 + $0x28] sm:$0xff]  ;;  %v34_v11 = vld [vmem:[%s489_s1 + $0x20] sm:$0xff] }
   0x5   :  { %51 = vmatpush.msra.mxu0 %v44_v1  ;;  %170 = vmatpush.msra.mxu1 %v44_v1  ;;  %v33_v12 = vld [vmem:[%s489_s1 + $0x18] sm:$0xff]  ;;  %v32_v13 = vld [vmem:[%s489_s1 + $0x10] sm:$0xff]  ;;  %v31_v14 = vld [vmem:[%s489_s1 + $0x8] sm:$0xff] }
   0x6   :  { %174 = vmatpush.msra.mxu2 %v43_v2  ;;  %175 = vmatpush.msra.mxu3 %v43_v2  ;;  %v30_v15 = vld [vmem:[%s489_s1] sm:$0xff]  ;;  %v337_v20 = vld [vmem:[%s491_s0 + $0x48] sm:$0xff]  ;;  %v361_v24 = vld [vmem:[%s491_s0 + $0x50] sm:$0xff] }
   0x7   :  { %52 = vmatpush.msra.mxu0 %v43_v2  ;;  %173 = vmatpush.msra.mxu1 %v43_v2  ;;  %v319_v16 = vld [vmem:[%s491_s0 + $0x40] sm:$0xff]  ;;  %v342_v21 = vld [vmem:[%s491_s0 + $0x68] sm:$0xff]  ;;  %v366_v25 = vld [vmem:[%s491_s0 + $0x70] sm:$0xff] }
   0x8   :  { %177 = vmatpush.msra.mxu2 %v42_v3  ;;  %178 = vmatpush.msra.mxu3 %v42_v3  ;;  %v324_v17 = vld [vmem:[%s491_s0 + $0x60] sm:$0xff]  ;;  %v347_v22 = vld [vmem:[%s491_s0 + $0x8] sm:$0xff]  ;;  %v371_v26 = vld [vmem:[%s491_s0 + $0x10] sm:$0xff] }
   0x9   :  { %53 = vmatpush.msra.mxu0 %v42_v3  ;;  %176 = vmatpush.msra.mxu1 %v42_v3  ;;  %v14_v18 = vld [vmem:[%s491_s0] sm:$0xff]  ;;  %v352_v23 = vld [vmem:[%s491_s0 + $0x28] sm:$0xff]  ;;  %v376_v27 = vld [vmem:[%s491_s0 + $0x30] sm:$0xff] }
   0xa   :  { %180 = vmatpush.msra.mxu2 %v41_v4  ;;  %181 = vmatpush.msra.mxu3 %v41_v4  ;;  %v18_v19 = vld [vmem:[%s491_s0 + $0x20] sm:$0xff]  ;;  %v385_v28 = vld [vmem:[%s491_s0 + $0x58] sm:$0xff] }
   0xb   :  { %54 = vmatpush.msra.mxu0 %v41_v4  ;;  %179 = vmatpush.msra.mxu1 %v41_v4  ;;  %v390_v29 = vld [vmem:[%s491_s0 + $0x78] sm:$0xff]  ;;  %v409_v32 = vld [vmem:[%s490_s2] ss:$0 sm:$0xff] }
   0xc   :  { %183 = vmatpush.msra.mxu2 %v40_v5  ;;  %184 = vmatpush.msra.mxu3 %v40_v5  ;;  %v395_v30 = vld [vmem:[%s491_s0 + $0x18] sm:$0xff] }
   0xd   :  { %55 = vmatpush.msra.mxu0 %v40_v5  ;;  %182 = vmatpush.msra.mxu1 %v40_v5  ;;  %v400_v31 = vld [vmem:[%s491_s0 + $0x38] sm:$0xff] }
   0xe   :  { %186 = vmatpush.msra.mxu2 %v39_v6  ;;  %187 = vmatpush.msra.mxu3 %v39_v6 }
   0xf   :  { %56 = vmatpush.msra.mxu0 %v39_v6  ;;  %185 = vmatpush.msra.mxu1 %v39_v6 }
  0x10   :  { %189 = vmatpush.msra.mxu2 %v38_v7  ;;  %190 = vmatpush.msra.mxu3 %v38_v7 }
  0x11   :  { %57 = vmatpush.msra.mxu0 %v38_v7  ;;  %188 = vmatpush.msra.mxu1 %v38_v7 }
  0x12   :  { %192 = vmatpush.msra.mxu2 %v37_v8  ;;  %193 = vmatpush.msra.mxu3 %v37_v8 }
  0x13   :  { %58 = vmatpush.msra.mxu0 %v37_v8  ;;  %191 = vmatpush.msra.mxu1 %v37_v8 }
  0x14   :  { %195 = vmatpush.msra.mxu2 %v36_v9  ;;  %196 = vmatpush.msra.mxu3 %v36_v9 }
  0x15   :  { %59 = vmatpush.msra.mxu0 %v36_v9  ;;  %194 = vmatpush.msra.mxu1 %v36_v9 }
  0x16   :  { %198 = vmatpush.msra.mxu2 %v35_v10  ;;  %199 = vmatpush.msra.mxu3 %v35_v10 }
  0x17   :  { %60 = vmatpush.msra.mxu0 %v35_v10  ;;  %197 = vmatpush.msra.mxu1 %v35_v10 }
  0x18   :  { %201 = vmatpush.msra.mxu2 %v34_v11  ;;  %202 = vmatpush.msra.mxu3 %v34_v11 }
  0x19   :  { %61 = vmatpush.msra.mxu0 %v34_v11  ;;  %200 = vmatpush.msra.mxu1 %v34_v11 }
  0x1a   :  { %204 = vmatpush.msra.mxu2 %v33_v12  ;;  %205 = vmatpush.msra.mxu3 %v33_v12 }
  0x1b   :  { %62 = vmatpush.msra.mxu0 %v33_v12  ;;  %203 = vmatpush.msra.mxu1 %v33_v12 }
  0x1c   :  { %207 = vmatpush.msra.mxu2 %v32_v13  ;;  %208 = vmatpush.msra.mxu3 %v32_v13 }
  0x1d   :  { %63 = vmatpush.msra.mxu0 %v32_v13  ;;  %206 = vmatpush.msra.mxu1 %v32_v13 }
  0x1e   :  { %210 = vmatpush.msra.mxu2 %v31_v14  ;;  %211 = vmatpush.msra.mxu3 %v31_v14 }
  0x1f   :  { %64 = vmatpush.msra.mxu0 %v31_v14  ;;  %209 = vmatpush.msra.mxu1 %v31_v14 }
  0x20   :  { %213 = vmatpush.msra.mxu2 %v30_v15  ;;  %214 = vmatpush.msra.mxu3 %v30_v15 }
  0x21   :  { %90 = vmatmul.f32.vlgmr.msra.gmra.mxu2 %v319_v16  ;;  %102 = vmatmul.f32.vlgmr.msra.gmra.mxu3 %v324_v17 }
  0x22   :  { %65 = vmatpush.msra.mxu0 %v30_v15  ;;  %212 = vmatpush.msra.mxu1 %v30_v15 }
  0x23   :  { %66 = vmatmul.f32.vlgmr.msra.gmra.mxu0 %v14_v18  ;;  %78 = vmatmul.f32.vlgmr.msra.gmra.mxu1 %v18_v19 }
  0x29   :  { %93 = vmatmul.f32.gmra.mxu2 %v337_v20  ;;  %105 = vmatmul.f32.gmra.mxu3 %v342_v21 }
  0x2b   :  { %69 = vmatmul.f32.gmra.mxu0 %v347_v22  ;;  %81 = vmatmul.f32.gmra.mxu1 %v352_v23 }
  0x31   :  { %96 = vmatmul.f32.gmra.mxu2 %v361_v24  ;;  %108 = vmatmul.f32.gmra.mxu3 %v366_v25 }
  0x33   :  { %72 = vmatmul.f32.gmra.mxu0 %v371_v26  ;;  %84 = vmatmul.f32.gmra.mxu1 %v376_v27 }
  0x39   :  { %99 = vmatmul.f32.gmra.mxu2 %v385_v28  ;;  %111 = vmatmul.f32.gmra.mxu3 %v390_v29 }
  0x3b   :  { %75 = vmatmul.f32.gmra.mxu0 %v395_v30  ;;  %87 = vmatmul.f32.gmra.mxu1 %v400_v31 }
  0xa0   :  { %v67_v33 = vpop.f32.mrf.mxu0  ;;  %v79_v34 = vpop.f32.mrf.mxu1 }
  0xa1   :  { %v68_v35 = vadd.f32 %v409_v32, %v67_v33  ;;  %v80_v36 = vadd.f32 %v409_v32, %v79_v34 }
  0xa3   :  { %216 = vtanh.f32 %v68_v35 }
  0xa4   :  { %218 = vtanh.f32 %v80_v36  ;;  %v91_v37 = vpop.f32.mrf.mxu2  ;;  %v103_v38 = vpop.f32.mrf.mxu3 }
  0xa5   :  { %v92_v39 = vadd.f32 %v409_v32, %v91_v37  ;;  %v104_v40 = vadd.f32 %v409_v32, %v103_v38 }
  0xa7   :  { %220 = vtanh.f32 %v92_v39 }
  0xa8   :  { %222 = vtanh.f32 %v104_v40  ;;  %v70_v41 = vpop.f32.mrf.mxu0  ;;  %v82_v42 = vpop.f32.mrf.mxu1 }
  0xa9   :  { %v217_v43 = vpop.eup %216  ;;  %v71_v44 = vadd.f32 %v409_v32, %v70_v41  ;;  %v83_v45 = vadd.f32 %v409_v32, %v82_v42 }
  0xaa   :  { %v219_v46 = vpop.eup %218  ;;  %v131_v47 = vadd.f32 %v217_v43, %v14_v18 }
  0xab   :  { %v135_v48 = vadd.f32 %v219_v46, %v18_v19  ;;  %224 = vtanh.f32 %v71_v44 }
  0xac   :  { %147 = vst [vmem:[%s492_s3] sm:$0xff] %v131_v47  ;;  %226 = vtanh.f32 %v83_v45  ;;  %v94_v49 = vpop.f32.mrf.mxu2  ;;  %v106_v50 = vpop.f32.mrf.mxu3 }
  0xad   :  { %v221_v51 = vpop.eup %220  ;;  %151 = vst [vmem:[%s492_s3 + $0x20] sm:$0xff] %v135_v48  ;;  %v95_v52 = vadd.f32 %v409_v32, %v94_v49  ;;  %v107_v53 = vadd.f32 %v409_v32, %v106_v50 }
  0xae   :  { %v223_v54 = vpop.eup %222  ;;  %v139_v55 = vadd.f32 %v221_v51, %v319_v16 }
  0xaf   :  { %v143_v56 = vadd.f32 %v223_v54, %v324_v17  ;;  %228 = vtanh.f32 %v95_v52 }
  0xb0   :  { %155 = vst [vmem:[%s492_s3 + $0x40] sm:$0xff] %v139_v55  ;;  %230 = vtanh.f32 %v107_v53  ;;  %v73_v57 = vpop.f32.mrf.mxu0  ;;  %v85_v58 = vpop.f32.mrf.mxu1 }
  0xb1   :  { %v225_v59 = vpop.eup %224  ;;  %159 = vst [vmem:[%s492_s3 + $0x60] sm:$0xff] %v143_v56  ;;  %v74_v60 = vadd.f32 %v409_v32, %v73_v57  ;;  %v86_v61 = vadd.f32 %v409_v32, %v85_v58 }
  0xb2   :  { %v227_v62 = vpop.eup %226  ;;  %v132_v63 = vadd.f32 %v225_v59, %v347_v22 }
  0xb3   :  { %v136_v0 = vadd.f32 %v227_v62, %v352_v23  ;;  %232 = vtanh.f32 %v74_v60 }
  0xb4   :  { %148 = vst [vmem:[%s492_s3 + $0x8] sm:$0xff] %v132_v63  ;;  %234 = vtanh.f32 %v86_v61  ;;  %v97_v1 = vpop.f32.mrf.mxu2  ;;  %v109_v2 = vpop.f32.mrf.mxu3 }
  0xb5   :  { %v229_v3 = vpop.eup %228  ;;  %152 = vst [vmem:[%s492_s3 + $0x28] sm:$0xff] %v136_v0  ;;  %v98_v4 = vadd.f32 %v409_v32, %v97_v1  ;;  %v110_v5 = vadd.f32 %v409_v32, %v109_v2 }
  0xb6   :  { %v231_v6 = vpop.eup %230  ;;  %v140_v7 = vadd.f32 %v229_v3, %v337_v20 }
  0xb7   :  { %v144_v8 = vadd.f32 %v231_v6, %v342_v21  ;;  %236 = vtanh.f32 %v98_v4 }
  0xb8   :  { %156 = vst [vmem:[%s492_s3 + $0x48] sm:$0xff] %v140_v7  ;;  %238 = vtanh.f32 %v110_v5  ;;  %v76_v9 = vpop.f32.mrf.mxu0  ;;  %v88_v10 = vpop.f32.mrf.mxu1 }
  0xb9   :  { %v233_v11 = vpop.eup %232  ;;  %160 = vst [vmem:[%s492_s3 + $0x68] sm:$0xff] %v144_v8  ;;  %v77_v12 = vadd.f32 %v409_v32, %v76_v9  ;;  %v89_v13 = vadd.f32 %v409_v32, %v88_v10 }
  0xba   :  { %v235_v14 = vpop.eup %234  ;;  %v133_v15 = vadd.f32 %v233_v11, %v371_v26 }
  0xbb   :  { %v137_v16 = vadd.f32 %v235_v14, %v376_v27  ;;  %240 = vtanh.f32 %v77_v12 }
  0xbc   :  { %149 = vst [vmem:[%s492_s3 + $0x10] sm:$0xff] %v133_v15  ;;  %242 = vtanh.f32 %v89_v13  ;;  %v100_v17 = vpop.f32.mrf.mxu2  ;;  %v112_v18 = vpop.f32.mrf.mxu3 }
  0xbd   :  { %v237_v19 = vpop.eup %236  ;;  %153 = vst [vmem:[%s492_s3 + $0x30] sm:$0xff] %v137_v16  ;;  %v101_v20 = vadd.f32 %v409_v32, %v100_v17  ;;  %v113_v21 = vadd.f32 %v409_v32, %v112_v18 }
  0xbe   :  { %v239_v22 = vpop.eup %238  ;;  %v141_v23 = vadd.f32 %v237_v19, %v361_v24 }
  0xbf   :  { %v145_v26 = vadd.f32 %v239_v22, %v366_v25  ;;  %244 = vtanh.f32 %v101_v20 }
  0xc0   :  { %157 = vst [vmem:[%s492_s3 + $0x50] sm:$0xff] %v141_v23  ;;  %246 = vtanh.f32 %v113_v21 }
  0xc1   :  { %v241_v27 = vpop.eup %240  ;;  %161 = vst [vmem:[%s492_s3 + $0x70] sm:$0xff] %v145_v26 }
  0xc2   :  { %v243_v33 = vpop.eup %242  ;;  %v134_v34 = vadd.f32 %v241_v27, %v395_v30 }
  0xc3   :  { %v138_v32 = vadd.f32 %v243_v33, %v400_v31 }
  0xc4   :  { %150 = vst [vmem:[%s492_s3 + $0x18] sm:$0xff] %v134_v34 }
  0xc5   :  { %v245_v24 = vpop.eup %244  ;;  %154 = vst [vmem:[%s492_s3 + $0x38] sm:$0xff] %v138_v32 }
  0xc6   :  { %v247_v25 = vpop.eup %246  ;;  %v142_v35 = vadd.f32 %v245_v24, %v385_v28 }
  0xc7   :  { %v146_v36 = vadd.f32 %v247_v25, %v390_v29 }
  0xc8   :  { %158 = vst [vmem:[%s492_s3 + $0x58] sm:$0xff] %v142_v35 }
  0xc9   :  { %162 = vst [vmem:[%s492_s3 + $0x78] sm:$0xff] %v146_v36 }

</bundles_post_ra>
